<compile_context>
chip_gen: v6e
topology: v6e:2x2x1
jax: 0.10.0
libtpu: 0.0.40
codegen_flags: <defaults>
</compile_context>

<pallas_src>
import jax
import jax.numpy as jnp
from jax.experimental import pallas as pl
from jax.experimental.pallas import tpu as pltpu


def _round_up(n, m):
    return ((n + m - 1) // m) * m


# --------------------------------------------------------------------------- #
# Pallas kernel: sequential RNN recurrence over one time chunk.
# --------------------------------------------------------------------------- #
def rnn_recurrence_kernel(pre_ref, whh_ref, h_all_ref, h_carry):
    """pre_ref:   (T_CHUNK, B_pad, H_pad)  pre-activations x_t @ W_ih^T + b_ih + b_hh
       whh_ref:   (H_pad, H_pad)           recurrent weight (transposed, zero-padded)
       h_all_ref: (T_CHUNK, B_pad, H_pad)  all hidden states (lane-dense output)
       h_carry:   (B_pad, H_pad)           hidden state carried across grid steps
    """
    c = pl.program_id(0)

    @pl.when(c == 0)
    def _():
        h_carry[...] = jnp.zeros_like(h_carry)

    whh = whh_ref[...]                      # resident weight; same block every step
    t_chunk = pre_ref.shape[0]

    def step(t, h):
        h_new = jnp.tanh(
            pre_ref[t]                      # index on leading (time) axis
            + jnp.dot(h, whh, preferred_element_type=jnp.float32))
        h_all_ref[t] = h_new.astype(h_all_ref.dtype)
        return h_new

    # Fully unrolled so the LLO scheduler can overlap the tanh (EUP) + VPU work
    # of step t with the W_hh MXU matmul of step t+1; only the MXU chain is
    # serial.  t_chunk is bounded (<= 64) so unroll size stays reasonable.
    h_final = jax.lax.fori_loop(0, t_chunk, step, h_carry[...], unroll=True)
    h_carry[...] = h_final


def _run_recurrence(pre, w_hh_p, t_chunk):
    T_pad, B_pad, H_pad = pre.shape
    num_chunks = T_pad // t_chunk

    grid_spec = pltpu.PrefetchScalarGridSpec(
        num_scalar_prefetch=0,
        grid=(num_chunks,),
        in_specs=[
            # Per-chunk pre-activations (auto double-buffered by BlockSpec).
            pl.BlockSpec((t_chunk, B_pad, H_pad), lambda c: (c, 0, 0)),
            # Recurrent weight: same block index every chunk -> DMA'd once.
            pl.BlockSpec((H_pad, H_pad), lambda c: (0, 0)),
        ],
        # One large contiguous, lane-dense writeback per chunk.
        out_specs=pl.BlockSpec((t_chunk, B_pad, H_pad), lambda c: (c, 0, 0)),
        scratch_shapes=[pltpu.VMEM((B_pad, H_pad), jnp.float32)],
    )

    return pl.pallas_call(
        rnn_recurrence_kernel,
        out_shape=jax.ShapeDtypeStruct((T_pad, B_pad, H_pad), jnp.float32),
        grid_spec=grid_spec,
        compiler_params=pltpu.CompilerParams(
            dimension_semantics=("arbitrary",)),    # sequential carry over chunks
    )(pre, w_hh_p)


# --------------------------------------------------------------------------- #
# Wrapper: hoisted projections + Pallas recurrence.
# --------------------------------------------------------------------------- #
def rnn_gate_forward(x, pparams, *, t_chunk=64):
    """x: (B, T, I) float32.  pparams: padded params from prepare_params()."""
    B, T, I = x.shape
    B_pad = _round_up(B, 8)                 # f32 sublane granularity
    t_chunk = min(t_chunk, T)
    T_pad = _round_up(T, t_chunk)

    # Pad the SMALL input tensor (not the large pre-activation tensor).  Padded
    # rows/steps produce garbage hidden states that are sliced away afterwards.
    x_p = jnp.pad(x, ((0, B_pad - B), (0, T_pad - T), (0, 0)))

    # (1) Hoisted input projection: one big matmul over all T*B rows, biases
    #     pre-summed, emitted directly in time-major (T_pad, B_pad, H_pad)
    #     layout.  No dependence on h -> none of this is on the serial path.
    pre = jnp.einsum("bti,ih->tbh", x_p, pparams["w_ih_p"]) + pparams["b_sum"]

    # (2) Serial recurrence in Pallas (vreg-carried h, chunked lane-dense
    #     hidden-state writeback).
    h_all = _run_recurrence(pre, pparams["w_hh_p"], t_chunk)

    # (3) Hoisted output projection: one big (T*B, H_pad) x (H_pad, O) matmul
    #     instead of T tiny O=4 masked stores inside the loop.
    h_all = h_all[:T, :B, :]
    out = jnp.einsum("tbh,ho->bto", h_all, pparams["w_lin_p"]) + pparams["b_lin"]
    return out


# --------------------------------------------------------------------------- #
# Parameters.
# --------------------------------------------------------------------------- #
def init_params(key, input_size, hidden_size, output_size):
    """PyTorch-shaped weights (pre-transposed), uniform +-1/sqrt(hidden)."""
    ks = jax.random.split(key, 6)
    bound = 1.0 / float(jnp.sqrt(jnp.float32(hidden_size)))
    u = lambda k, shape: jax.random.uniform(k, shape, jnp.float32, -bound, bound)
    return {
        "w_ih_t":  u(ks[0], (hidden_size, input_size)).T,    # (I, H)
        "w_hh_t":  u(ks[1], (hidden_size, hidden_size)).T,   # (H, H)
        "b_ih":    u(ks[2], (hidden_size,)),                 # (H,)
        "b_hh":    u(ks[3], (hidden_size,)),                 # (H,)
        "w_lin_t": u(ks[4], (output_size, hidden_size)).T,   # (H, O)
        "b_lin":   u(ks[5], (output_size,)),                 # (O,)
    }


def prepare_params(params, *, lane=128, weight_dtype=jnp.float32):
    """Pad hidden dim to a multiple of 128 (lane axis) and pre-sum the RNN biases.
    Done once, outside the forward pass."""
    I, H = params["w_ih_t"].shape
    H_pad = _round_up(H, lane)
    dh = H_pad - H
    return {
        "w_ih_p":  jnp.pad(params["w_ih_t"], ((0, 0), (0, dh))).astype(weight_dtype),
        "w_hh_p":  jnp.pad(params["w_hh_t"], ((0, dh), (0, dh))).astype(weight_dtype),
        "w_lin_p": jnp.pad(params["w_lin_t"], ((0, dh), (0, 0))).astype(weight_dtype),
        "b_sum":   jnp.pad(params["b_ih"] + params["b_hh"], (0, dh)),
        "b_lin":   params["b_lin"],
    }


# --------------------------------------------------------------------------- #
# Pure-JAX reference (unpadded) for correctness.
# --------------------------------------------------------------------------- #
def rnn_gate_reference(x, params):
    def step(h, x_t):
        h_new = jnp.tanh(x_t @ params["w_ih_t"] + params["b_ih"]
                         + h @ params["w_hh_t"] + params["b_hh"])
        y = h_new @ params["w_lin_t"] + params["b_lin"]
        return h_new, y

    B = x.shape[0]
    H = params["w_hh_t"].shape[0]
    h0 = jnp.zeros((B, H), jnp.float32)
    _, ys = jax.lax.scan(step, h0, jnp.transpose(x, (1, 0, 2)))
    return jnp.transpose(ys, (1, 0, 2))


if __name__ == "__main__":
    batch, seq, input_size, hidden_size, output_size = 2, 8, 16, 32, 4

    key = jax.random.PRNGKey(0)
    kx, kp = jax.random.split(key)
    x = jax.random.normal(kx, (batch, seq, input_size), jnp.float32)
    params = init_params(kp, input_size, hidden_size, output_size)
    pparams = prepare_params(params)

    fwd = jax.jit(rnn_gate_forward)
    out = jax.block_until_ready(fwd(x, pparams))

    ref = rnn_gate_reference(x, params)
    assert out.shape == (batch, seq, output_size)
    assert jnp.allclose(out, ref, atol=1e-5, rtol=1e-5), "mismatch vs reference"

    print("KERNEL_OK")
</pallas_src>

<mosaic_0001>
module attributes {stable_mosaic.version = 11 : i64} {
  func.func @rnn_recurrence_kernel(%arg0: i32, %arg1: memref<8x8x128xf32, #tpu.memory_space<vmem>>, %arg2: memref<128x128xf32, #tpu.memory_space<vmem>>, %arg3: memref<8x8x128xf32, #tpu.memory_space<vmem>>, %arg4: memref<8x128xf32, #tpu.memory_space<vmem>>) attributes {dimension_semantics = [#tpu.dimension_semantics<arbitrary>], iteration_bounds = array<i64: 1>, scalar_prefetch = 0 : i64, scratch_operands = 1 : i64, tpu.core_type = #tpu.core_type<tc>, window_params = [{transform_indices = @transform_0, window_bounds = array<i64: 8, 8, 128>}, {pipeline_mode = #tpu.pipeline_mode<synchronous>, transform_indices = @transform_1, window_bounds = array<i64: 128, 128>}, {transform_indices = @transform_2, window_bounds = array<i64: 8, 8, 128>}]} {
    %c0_i32 = arith.constant 0 : i32
    %0 = arith.cmpi eq, %arg0, %c0_i32 : i32
    %1 = arith.extui %0 : i1 to i32
    %c0_i32_0 = arith.constant 0 : i32
    %2 = arith.cmpi ne, %1, %c0_i32_0 : i32
    scf.if %2 {
      %cst_46 = arith.constant 0.000000e+00 : f32
      %86 = vector.broadcast %cst_46 : f32 to vector<8x128xf32>
      %c0_47 = arith.constant 0 : index
      %c0_48 = arith.constant 0 : index
      %87 = vector.load %arg4[%c0_47, %c0_48] : memref<8x128xf32, #tpu.memory_space<vmem>>, vector<8x128xf32>
      tpu.vector_store %arg4[%c0_47, %c0_48], %86 {strides = array<i32>} : memref<8x128xf32, #tpu.memory_space<vmem>>, vector<8x128xf32>,
    } else {
    }
    %c0 = arith.constant 0 : index
    %c0_1 = arith.constant 0 : index
    %3 = vector.load %arg2[%c0, %c0_1] : memref<128x128xf32, #tpu.memory_space<vmem>>, vector<128x128xf32>
    %c0_2 = arith.constant 0 : index
    %c0_3 = arith.constant 0 : index
    %4 = vector.load %arg4[%c0_2, %c0_3] : memref<8x128xf32, #tpu.memory_space<vmem>>, vector<8x128xf32>
    %c0_i32_4 = arith.constant 0 : i32
    %5 = arith.index_cast %c0_i32_4 : i32 to index
    %c0_5 = arith.constant 0 : index
    %c0_6 = arith.constant 0 : index
    %6 = vector.load %arg1[%5, %c0_5, %c0_6] : memref<8x8x128xf32, #tpu.memory_space<vmem>>, vector<1x8x128xf32>
    %7 = vector.shape_cast %6 : vector<1x8x128xf32> to vector<8x128xf32>
    %cst = arith.constant dense<0.000000e+00> : vector<8x128xf32>
    %8 = tpu.matmul %4, %3, %cst {dimension_numbers = #tpu.dot_dimension_numbers<[1], [0], [0], [1], [0, 0, 1, 1], [], []>} : vector<8x128xf32>, vector<128x128xf32>, vector<8x128xf32> -> vector<8x128xf32>
    %9 = arith.addf %7, %8 : vector<8x128xf32>
    %10 = math.tanh %9 : vector<8x128xf32>
    %11 = arith.index_cast %c0_i32_4 : i32 to index
    %c0_7 = arith.constant 0 : index
    %c0_8 = arith.constant 0 : index
    %12 = vector.load %arg3[%11, %c0_7, %c0_8] : memref<8x8x128xf32, #tpu.memory_space<vmem>>, vector<1x8x128xf32>
    %13 = vector.shape_cast %12 : vector<1x8x128xf32> to vector<8x128xf32>
    %14 = vector.shape_cast %10 : vector<8x128xf32> to vector<1x8x128xf32>
    tpu.vector_store %arg3[%11, %c0_7, %c0_8], %14 {strides = array<i32>} : memref<8x8x128xf32, #tpu.memory_space<vmem>>, vector<1x8x128xf32>,
    %c1_i32 = arith.constant 1 : i32
    %15 = arith.index_cast %c1_i32 : i32 to index
    %c0_9 = arith.constant 0 : index
    %c0_10 = arith.constant 0 : index
    %16 = vector.load %arg1[%15, %c0_9, %c0_10] : memref<8x8x128xf32, #tpu.memory_space<vmem>>, vector<1x8x128xf32>
    %17 = vector.shape_cast %16 : vector<1x8x128xf32> to vector<8x128xf32>
    %cst_11 = arith.constant dense<0.000000e+00> : vector<8x128xf32>
    %18 = tpu.matmul %10, %3, %cst_11 {dimension_numbers = #tpu.dot_dimension_numbers<[1], [0], [0], [1], [0, 0, 1, 1], [], []>} : vector<8x128xf32>, vector<128x128xf32>, vector<8x128xf32> -> vector<8x128xf32>
    %19 = arith.addf %17, %18 : vector<8x128xf32>
    %20 = math.tanh %19 : vector<8x128xf32>
    %21 = arith.index_cast %c1_i32 : i32 to index
    %c0_12 = arith.constant 0 : index
    %c0_13 = arith.constant 0 : index
    %22 = vector.load %arg3[%21, %c0_12, %c0_13] : memref<8x8x128xf32, #tpu.memory_space<vmem>>, vector<1x8x128xf32>
    %23 = vector.shape_cast %22 : vector<1x8x128xf32> to vector<8x128xf32>
    %24 = vector.shape_cast %20 : vector<8x128xf32> to vector<1x8x128xf32>
    tpu.vector_store %arg3[%21, %c0_12, %c0_13], %24 {strides = array<i32>} : memref<8x8x128xf32, #tpu.memory_space<vmem>>, vector<1x8x128xf32>,
    %c2_i32 = arith.constant 2 : i32
    %25 = arith.index_cast %c2_i32 : i32 to index
    %c0_14 = arith.constant 0 : index
    %c0_15 = arith.constant 0 : index
    %26 = vector.load %arg1[%25, %c0_14, %c0_15] : memref<8x8x128xf32, #tpu.memory_space<vmem>>, vector<1x8x128xf32>
    %27 = vector.shape_cast %26 : vector<1x8x128xf32> to vector<8x128xf32>
    %cst_16 = arith.constant dense<0.000000e+00> : vector<8x128xf32>
    %28 = tpu.matmul %20, %3, %cst_16 {dimension_numbers = #tpu.dot_dimension_numbers<[1], [0], [0], [1], [0, 0, 1, 1], [], []>} : vector<8x128xf32>, vector<128x128xf32>, vector<8x128xf32> -> vector<8x128xf32>
    %29 = arith.addf %27, %28 : vector<8x128xf32>
    %30 = math.tanh %29 : vector<8x128xf32>
    %31 = arith.index_cast %c2_i32 : i32 to index
    %c0_17 = arith.constant 0 : index
    %c0_18 = arith.constant 0 : index
    %32 = vector.load %arg3[%31, %c0_17, %c0_18] : memref<8x8x128xf32, #tpu.memory_space<vmem>>, vector<1x8x128xf32>
    %33 = vector.shape_cast %32 : vector<1x8x128xf32> to vector<8x128xf32>
    %34 = vector.shape_cast %30 : vector<8x128xf32> to vector<1x8x128xf32>
    tpu.vector_store %arg3[%31, %c0_17, %c0_18], %34 {strides = array<i32>} : memref<8x8x128xf32, #tpu.memory_space<vmem>>, vector<1x8x128xf32>,
    %c3_i32 = arith.constant 3 : i32
    %35 = arith.index_cast %c3_i32 : i32 to index
    %c0_19 = arith.constant 0 : index
    %c0_20 = arith.constant 0 : index
    %36 = vector.load %arg1[%35, %c0_19, %c0_20] : memref<8x8x128xf32, #tpu.memory_space<vmem>>, vector<1x8x128xf32>
    %37 = vector.shape_cast %36 : vector<1x8x128xf32> to vector<8x128xf32>
    %cst_21 = arith.constant dense<0.000000e+00> : vector<8x128xf32>
    %38 = tpu.matmul %30, %3, %cst_21 {dimension_numbers = #tpu.dot_dimension_numbers<[1], [0], [0], [1], [0, 0, 1, 1], [], []>} : vector<8x128xf32>, vector<128x128xf32>, vector<8x128xf32> -> vector<8x128xf32>
    %39 = arith.addf %37, %38 : vector<8x128xf32>
    %40 = math.tanh %39 : vector<8x128xf32>
    %41 = arith.index_cast %c3_i32 : i32 to index
    %c0_22 = arith.constant 0 : index
    %c0_23 = arith.constant 0 : index
    %42 = vector.load %arg3[%41, %c0_22, %c0_23] : memref<8x8x128xf32, #tpu.memory_space<vmem>>, vector<1x8x128xf32>
    %43 = vector.shape_cast %42 : vector<1x8x128xf32> to vector<8x128xf32>
    %44 = vector.shape_cast %40 : vector<8x128xf32> to vector<1x8x128xf32>
    tpu.vector_store %arg3[%41, %c0_22, %c0_23], %44 {strides = array<i32>} : memref<8x8x128xf32, #tpu.memory_space<vmem>>, vector<1x8x128xf32>,
    %c4_i32 = arith.constant 4 : i32
    %45 = arith.index_cast %c4_i32 : i32 to index
    %c0_24 = arith.constant 0 : index
    %c0_25 = arith.constant 0 : index
    %46 = vector.load %arg1[%45, %c0_24, %c0_25] : memref<8x8x128xf32, #tpu.memory_space<vmem>>, vector<1x8x128xf32>
    %47 = vector.shape_cast %46 : vector<1x8x128xf32> to vector<8x128xf32>
    %cst_26 = arith.constant dense<0.000000e+00> : vector<8x128xf32>
    %48 = tpu.matmul %40, %3, %cst_26 {dimension_numbers = #tpu.dot_dimension_numbers<[1], [0], [0], [1], [0, 0, 1, 1], [], []>} : vector<8x128xf32>, vector<128x128xf32>, vector<8x128xf32> -> vector<8x128xf32>
    %49 = arith.addf %47, %48 : vector<8x128xf32>
    %50 = math.tanh %49 : vector<8x128xf32>
    %51 = arith.index_cast %c4_i32 : i32 to index
    %c0_27 = arith.constant 0 : index
    %c0_28 = arith.constant 0 : index
    %52 = vector.load %arg3[%51, %c0_27, %c0_28] : memref<8x8x128xf32, #tpu.memory_space<vmem>>, vector<1x8x128xf32>
    %53 = vector.shape_cast %52 : vector<1x8x128xf32> to vector<8x128xf32>
    %54 = vector.shape_cast %50 : vector<8x128xf32> to vector<1x8x128xf32>
    tpu.vector_store %arg3[%51, %c0_27, %c0_28], %54 {strides = array<i32>} : memref<8x8x128xf32, #tpu.memory_space<vmem>>, vector<1x8x128xf32>,
    %c5_i32 = arith.constant 5 : i32
    %55 = arith.index_cast %c5_i32 : i32 to index
    %c0_29 = arith.constant 0 : index
    %c0_30 = arith.constant 0 : index
    %56 = vector.load %arg1[%55, %c0_29, %c0_30] : memref<8x8x128xf32, #tpu.memory_space<vmem>>, vector<1x8x128xf32>
    %57 = vector.shape_cast %56 : vector<1x8x128xf32> to vector<8x128xf32>
    %cst_31 = arith.constant dense<0.000000e+00> : vector<8x128xf32>
    %58 = tpu.matmul %50, %3, %cst_31 {dimension_numbers = #tpu.dot_dimension_numbers<[1], [0], [0], [1], [0, 0, 1, 1], [], []>} : vector<8x128xf32>, vector<128x128xf32>, vector<8x128xf32> -> vector<8x128xf32>
    %59 = arith.addf %57, %58 : vector<8x128xf32>
    %60 = math.tanh %59 : vector<8x128xf32>
    %61 = arith.index_cast %c5_i32 : i32 to index
    %c0_32 = arith.constant 0 : index
    %c0_33 = arith.constant 0 : index
    %62 = vector.load %arg3[%61, %c0_32, %c0_33] : memref<8x8x128xf32, #tpu.memory_space<vmem>>, vector<1x8x128xf32>
    %63 = vector.shape_cast %62 : vector<1x8x128xf32> to vector<8x128xf32>
    %64 = vector.shape_cast %60 : vector<8x128xf32> to vector<1x8x128xf32>
    tpu.vector_store %arg3[%61, %c0_32, %c0_33], %64 {strides = array<i32>} : memref<8x8x128xf32, #tpu.memory_space<vmem>>, vector<1x8x128xf32>,
    %c6_i32 = arith.constant 6 : i32
    %65 = arith.index_cast %c6_i32 : i32 to index
    %c0_34 = arith.constant 0 : index
    %c0_35 = arith.constant 0 : index
    %66 = vector.load %arg1[%65, %c0_34, %c0_35] : memref<8x8x128xf32, #tpu.memory_space<vmem>>, vector<1x8x128xf32>
    %67 = vector.shape_cast %66 : vector<1x8x128xf32> to vector<8x128xf32>
    %cst_36 = arith.constant dense<0.000000e+00> : vector<8x128xf32>
    %68 = tpu.matmul %60, %3, %cst_36 {dimension_numbers = #tpu.dot_dimension_numbers<[1], [0], [0], [1], [0, 0, 1, 1], [], []>} : vector<8x128xf32>, vector<128x128xf32>, vector<8x128xf32> -> vector<8x128xf32>
    %69 = arith.addf %67, %68 : vector<8x128xf32>
    %70 = math.tanh %69 : vector<8x128xf32>
    %71 = arith.index_cast %c6_i32 : i32 to index
    %c0_37 = arith.constant 0 : index
    %c0_38 = arith.constant 0 : index
    %72 = vector.load %arg3[%71, %c0_37, %c0_38] : memref<8x8x128xf32, #tpu.memory_space<vmem>>, vector<1x8x128xf32>
    %73 = vector.shape_cast %72 : vector<1x8x128xf32> to vector<8x128xf32>
    %74 = vector.shape_cast %70 : vector<8x128xf32> to vector<1x8x128xf32>
    tpu.vector_store %arg3[%71, %c0_37, %c0_38], %74 {strides = array<i32>} : memref<8x8x128xf32, #tpu.memory_space<vmem>>, vector<1x8x128xf32>,
    %c7_i32 = arith.constant 7 : i32
    %75 = arith.index_cast %c7_i32 : i32 to index
    %c0_39 = arith.constant 0 : index
    %c0_40 = arith.constant 0 : index
    %76 = vector.load %arg1[%75, %c0_39, %c0_40] : memref<8x8x128xf32, #tpu.memory_space<vmem>>, vector<1x8x128xf32>
    %77 = vector.shape_cast %76 : vector<1x8x128xf32> to vector<8x128xf32>
    %cst_41 = arith.constant dense<0.000000e+00> : vector<8x128xf32>
    %78 = tpu.matmul %70, %3, %cst_41 {dimension_numbers = #tpu.dot_dimension_numbers<[1], [0], [0], [1], [0, 0, 1, 1], [], []>} : vector<8x128xf32>, vector<128x128xf32>, vector<8x128xf32> -> vector<8x128xf32>
    %79 = arith.addf %77, %78 : vector<8x128xf32>
    %80 = math.tanh %79 : vector<8x128xf32>
    %81 = arith.index_cast %c7_i32 : i32 to index
    %c0_42 = arith.constant 0 : index
    %c0_43 = arith.constant 0 : index
    %82 = vector.load %arg3[%81, %c0_42, %c0_43] : memref<8x8x128xf32, #tpu.memory_space<vmem>>, vector<1x8x128xf32>
    %83 = vector.shape_cast %82 : vector<1x8x128xf32> to vector<8x128xf32>
    %84 = vector.shape_cast %80 : vector<8x128xf32> to vector<1x8x128xf32>
    tpu.vector_store %arg3[%81, %c0_42, %c0_43], %84 {strides = array<i32>} : memref<8x8x128xf32, #tpu.memory_space<vmem>>, vector<1x8x128xf32>,
    %c8_i32 = arith.constant 8 : i32
    %c0_44 = arith.constant 0 : index
    %c0_45 = arith.constant 0 : index
    %85 = vector.load %arg4[%c0_44, %c0_45] : memref<8x128xf32, #tpu.memory_space<vmem>>, vector<8x128xf32>
    tpu.vector_store %arg4[%c0_44, %c0_45], %80 {strides = array<i32>} : memref<8x128xf32, #tpu.memory_space<vmem>>, vector<8x128xf32>,
    return
  }
  func.func @transform_0(%arg0: i32) -> (i32, i32, i32) {
    %c0_i32 = arith.constant 0 : i32
    %c0_i32_0 = arith.constant 0 : i32
    %c0_i32_1 = arith.constant 0 : i32
    return %arg0, %c0_i32, %c0_i32_0 : i32, i32, i32
  }
  func.func @transform_1(%arg0: i32) -> (i32, i32) {
    %c0_i32 = arith.constant 0 : i32
    %c0_i32_0 = arith.constant 0 : i32
    %c0_i32_1 = arith.constant 0 : i32
    return %c0_i32, %c0_i32_0 : i32, i32
  }
  func.func @transform_2(%arg0: i32) -> (i32, i32, i32) {
    %c0_i32 = arith.constant 0 : i32
    %c0_i32_0 = arith.constant 0 : i32
    %c0_i32_1 = arith.constant 0 : i32
    return %arg0, %c0_i32, %c0_i32_0 : i32, i32, i32
  }
}

</mosaic_0001>

<bundles_post_ra>
// kernel: rnn_gate_forward.1
= control target key start
LH: loop header
LB: loop body
LE: loop exit
PB: predicated region body
PF: predicated region fallthrough
CT: control target
= control target key end

     0   :  { %7 = vsyncpa [#allocation4], 0  ;;  %s1132_s9 = smov [#allocation3]   ;;  %s1508_s0 = inlined_call_operand.vmem [shape: f32[8,8,128], index: 0, kind: input, shape index: {}]   ;;  %s1509_s1 = inlined_call_operand.hbm [shape: f32[128,128], index: 1, kind: input, shape index: {}]   ;;  %s1510_s2 = inlined_call_operand.vmem [shape: f32[8,8,128], index: 2, kind: output, shape index: {}]  }
   0x1   :  { %s15_s10 = sshll.u32 %s1132_s9, 4  ;;  %s16_s10 = int_to_ptr.vmem [resolvable:$true] %s15_s10 }
   0x2   :  { %s1118_s11 = scalar_lea.vmem %s16_s10, 2048  ;;  %p1123_p1 = scmp.lt.s32.totalorder %s16_s10, %s16_s10 }
   0x3   :  { %p1119_p0 = scmp.ne.s32.totalorder %s16_s10, %s1118_s11  ;;  %p1124_p2 = scmp.lt.s32.totalorder %s1118_s11, %s1118_s11 }
   0x5   :  { %p1125_p3 = por %p1124_p2, %p1123_p1 }
   0x7   :  { %p1126_p4 = pnand %p1125_p3, %p1119_p0 }
   0x9   :  { %1129 = shalt.err (!%p1126_p4)
}
   0xa   :  { %s1133_s12 = smov 128   ;;  %s1134_s13 = smov 8  }
   0xb   :  { %21 = dma.hbm_to_vmem [thread:$0]  %s1509_s1, 2048, %s16_s10, [#allocation4], %s1133_s12, %s1133_s12, %s1134_s13  }
   0xc   :  { %1130 = dma.done.wait [#allocation4], 2048  }
   0xd   :  { %1131 = vsyncadd [#allocation4], 4294965248  ;;  %v1135_v0 = vmov 0.0   ;;  %vm1136_vm0 = vmmov 0   ;;  %v1161_v1 = vld [vmem:[#allocation3 + $0x78] sm:$0xff]  ;;  %v1163_v2 = vld [vmem:[#allocation3 + $0x70] sm:$0xff] }
   0xe   :  { %809 = vmatprep.subr.mxu0 %v1135_v0  ;;  %841 = vmatprep.mubr.msk.f32.mxu0 %vm1136_vm0, %v1135_v0  ;;  %v1168_v3 = vld [vmem:[#allocation3 + $0x68] sm:$0xff]  ;;  %v1174_v4 = vld [vmem:[#allocation3 + $0x60] sm:$0xff]  ;;  %v1180_v5 = vld [vmem:[#allocation3 + $0x58] sm:$0xff] }
   0xf   :  { %844 = vmatprep.subr.mxu1 %v1135_v0  ;;  %876 = vmatprep.mubr.msk.f32.mxu1 %vm1136_vm0, %v1135_v0  ;;  %v1186_v6 = vld [vmem:[#allocation3 + $0x50] sm:$0xff]  ;;  %v1192_v7 = vld [vmem:[#allocation3 + $0x48] sm:$0xff]  ;;  %v1198_v8 = vld [vmem:[#allocation3 + $0x40] sm:$0xff] }
  0x10   :  { %810 = vmatpush3.msra.mxu0 %v1161_v1  ;;  %845 = vmatpush3.msra.mxu1 %v1161_v1  ;;  %v1204_v9 = vld [vmem:[#allocation3 + $0x38] sm:$0xff]  ;;  %v1210_v10 = vld [vmem:[#allocation3 + $0x30] sm:$0xff]  ;;  %v1216_v11 = vld [vmem:[#allocation3 + $0x28] sm:$0xff] }
  0x11   :  { %811 = vmatprep.subr.mxu0 %v1135_v0  ;;  %846 = vmatprep.subr.mxu1 %v1135_v0  ;;  %v1222_v12 = vld [vmem:[#allocation3 + $0x20] sm:$0xff]  ;;  %v1228_v13 = vld [vmem:[#allocation3 + $0x18] sm:$0xff]  ;;  %v1234_v14 = vld [vmem:[#allocation3 + $0x10] sm:$0xff] }
  0x12   :  { %812 = vmatpush3.msra.mxu0 %v1163_v2  ;;  %847 = vmatpush3.msra.mxu1 %v1163_v2  ;;  %v1240_v15 = vld [vmem:[#allocation3 + $0x8] sm:$0xff]  ;;  %v1246_v16 = vld [vmem:[#allocation3] sm:$0xff]  ;;  %v661_v27 = vld [vmem:[%s1508_s0 + $0x10] sm:$0xff] }
  0x13   :  { %813 = vmatprep.subr.mxu0 %v1135_v0  ;;  %848 = vmatprep.subr.mxu1 %v1135_v0  ;;  %v47_v17 = vld [vmem:[%s1508_s0] sm:$0xff]  ;;  %v659_v22 = vld [vmem:[%s1508_s0 + $0x8] sm:$0xff]  ;;  %v663_v32 = vld [vmem:[%s1508_s0 + $0x18] sm:$0xff] }
  0x14   :  { %814 = vmatpush3.msra.mxu0 %v1168_v3  ;;  %849 = vmatpush3.msra.mxu1 %v1168_v3  ;;  %v665_v37 = vld [vmem:[%s1508_s0 + $0x20] sm:$0xff]  ;;  %v667_v42 = vld [vmem:[%s1508_s0 + $0x28] sm:$0xff]  ;;  %v669_v47 = vld [vmem:[%s1508_s0 + $0x30] sm:$0xff] }
  0x15   :  { %815 = vmatprep.subr.mxu0 %v1135_v0  ;;  %850 = vmatprep.subr.mxu1 %v1135_v0  ;;  %v671_v52 = vld [vmem:[%s1508_s0 + $0x38] sm:$0xff] }
  0x16   :  { %816 = vmatpush3.msra.mxu0 %v1174_v4  ;;  %851 = vmatpush3.msra.mxu1 %v1174_v4 }
  0x17   :  { %817 = vmatprep.subr.mxu0 %v1135_v0  ;;  %852 = vmatprep.subr.mxu1 %v1135_v0 }
  0x18   :  { %818 = vmatpush3.msra.mxu0 %v1180_v5  ;;  %853 = vmatpush3.msra.mxu1 %v1180_v5 }
  0x19   :  { %819 = vmatprep.subr.mxu0 %v1135_v0  ;;  %854 = vmatprep.subr.mxu1 %v1135_v0 }
  0x1a   :  { %820 = vmatpush3.msra.mxu0 %v1186_v6  ;;  %855 = vmatpush3.msra.mxu1 %v1186_v6 }
  0x1b   :  { %821 = vmatprep.subr.mxu0 %v1135_v0  ;;  %856 = vmatprep.subr.mxu1 %v1135_v0 }
  0x1c   :  { %822 = vmatpush3.msra.mxu0 %v1192_v7  ;;  %857 = vmatpush3.msra.mxu1 %v1192_v7 }
  0x1d   :  { %823 = vmatprep.subr.mxu0 %v1135_v0  ;;  %858 = vmatprep.subr.mxu1 %v1135_v0 }
  0x1e   :  { %824 = vmatpush3.msra.mxu0 %v1198_v8  ;;  %859 = vmatpush3.msra.mxu1 %v1198_v8 }
  0x1f   :  { %825 = vmatprep.subr.mxu0 %v1135_v0  ;;  %860 = vmatprep.subr.mxu1 %v1135_v0 }
  0x20   :  { %826 = vmatpush3.msra.mxu0 %v1204_v9  ;;  %861 = vmatpush3.msra.mxu1 %v1204_v9 }
  0x21   :  { %827 = vmatprep.subr.mxu0 %v1135_v0  ;;  %862 = vmatprep.subr.mxu1 %v1135_v0 }
  0x22   :  { %828 = vmatpush3.msra.mxu0 %v1210_v10  ;;  %863 = vmatpush3.msra.mxu1 %v1210_v10 }
  0x23   :  { %829 = vmatprep.subr.mxu0 %v1135_v0  ;;  %864 = vmatprep.subr.mxu1 %v1135_v0 }
  0x24   :  { %830 = vmatpush3.msra.mxu0 %v1216_v11  ;;  %865 = vmatpush3.msra.mxu1 %v1216_v11 }
  0x25   :  { %831 = vmatprep.subr.mxu0 %v1135_v0  ;;  %866 = vmatprep.subr.mxu1 %v1135_v0 }
  0x26   :  { %832 = vmatpush3.msra.mxu0 %v1222_v12  ;;  %867 = vmatpush3.msra.mxu1 %v1222_v12 }
  0x27   :  { %833 = vmatprep.subr.mxu0 %v1135_v0  ;;  %868 = vmatprep.subr.mxu1 %v1135_v0 }
  0x28   :  { %834 = vmatpush3.msra.mxu0 %v1228_v13  ;;  %869 = vmatpush3.msra.mxu1 %v1228_v13 }
  0x29   :  { %835 = vmatprep.subr.mxu0 %v1135_v0  ;;  %870 = vmatprep.subr.mxu1 %v1135_v0 }
  0x2a   :  { %836 = vmatpush3.msra.mxu0 %v1234_v14  ;;  %871 = vmatpush3.msra.mxu1 %v1234_v14 }
  0x2b   :  { %837 = vmatprep.subr.mxu0 %v1135_v0  ;;  %872 = vmatprep.subr.mxu1 %v1135_v0 }
  0x2c   :  { %838 = vmatpush3.msra.mxu0 %v1240_v15  ;;  %873 = vmatpush3.msra.mxu1 %v1240_v15 }
  0x2d   :  { %839 = vmatprep.subr.mxu0 %v1135_v0  ;;  %874 = vmatprep.subr.mxu1 %v1135_v0 }
  0x2e   :  { %840 = vmatpush3.msra.mxu0 %v1246_v16  ;;  %875 = vmatpush3.msra.mxu1 %v1246_v16 }
  0x2f   :  { %842 = vmatmul.mubr.f32.vlgmr.msra.gmra.mxu0 %v1135_v0  ;;  %879 = vmatprep.subr.mxu0 %v1135_v0 }
  0x30   :  { %880 = vmatpush3.msra.mxu0 %v1161_v1  ;;  %911 = vmatprep.mubr.msk.f32.mxu0 %vm1136_vm0, %v1135_v0 }
  0x31   :  { %881 = vmatprep.subr.mxu0 %v1135_v0  ;;  %914 = vmatprep.subr.mxu1 %v1135_v0 }
  0x32   :  { %882 = vmatpush3.msra.mxu0 %v1163_v2 }
  0x33   :  { %883 = vmatprep.subr.mxu0 %v1135_v0 }
  0x34   :  { %884 = vmatpush3.msra.mxu0 %v1168_v3 }
  0x35   :  { %885 = vmatprep.subr.mxu0 %v1135_v0 }
  0x36   :  { %886 = vmatpush3.msra.mxu0 %v1174_v4 }
  0x37   :  { %887 = vmatprep.subr.mxu0 %v1135_v0 }
  0x38   :  { %888 = vmatpush3.msra.mxu0 %v1180_v5 }
  0x39   :  { %889 = vmatprep.subr.mxu0 %v1135_v0 }
  0x3a   :  { %890 = vmatpush3.msra.mxu0 %v1186_v6 }
  0x3b   :  { %891 = vmatprep.subr.mxu0 %v1135_v0 }
  0x3c   :  { %892 = vmatpush3.msra.mxu0 %v1192_v7 }
  0x3d   :  { %893 = vmatprep.subr.mxu0 %v1135_v0 }
  0x3e   :  { %894 = vmatpush3.msra.mxu0 %v1198_v8 }
  0x3f   :  { %895 = vmatprep.subr.mxu0 %v1135_v0 }
  0x40   :  { %896 = vmatpush3.msra.mxu0 %v1204_v9 }
  0x41   :  { %897 = vmatprep.subr.mxu0 %v1135_v0 }
  0x42   :  { %898 = vmatpush3.msra.mxu0 %v1210_v10 }
  0x43   :  { %899 = vmatprep.subr.mxu0 %v1135_v0 }
  0x44   :  { %900 = vmatpush3.msra.mxu0 %v1216_v11 }
  0x45   :  { %901 = vmatprep.subr.mxu0 %v1135_v0 }
  0x46   :  { %902 = vmatpush3.msra.mxu0 %v1222_v12 }
  0x47   :  { %903 = vmatprep.subr.mxu0 %v1135_v0 }
  0x48   :  { %904 = vmatpush3.msra.mxu0 %v1228_v13 }
  0x49   :  { %905 = vmatprep.subr.mxu0 %v1135_v0 }
  0x4a   :  { %906 = vmatpush3.msra.mxu0 %v1234_v14 }
  0x4b   :  { %907 = vmatprep.subr.mxu0 %v1135_v0 }
  0x4c   :  { %908 = vmatpush3.msra.mxu0 %v1240_v15 }
  0x4d   :  { %909 = vmatprep.subr.mxu0 %v1135_v0 }
  0x4e   :  { %910 = vmatpush3.msra.mxu0 %v1246_v16 }
  0x4f   :  { %949 = vmatprep.subr.mxu0 %v1135_v0 }
  0xef   :  { %v114_v18 = vpop.f32.mrf.mxu0 }
  0xf0   :  { %v118_v19 = vadd.f32 %v114_v18, %v47_v17 }
  0xf1   :  { %v843_v20 = vpop.f32.mrf.mxu0 }
  0xf2   :  { %1094 = vtanh.f32 %v118_v19 }
  0xff   :  { %v1095_v21 = vpop.eup %1094 }
 0x100   :  { %120 = vst [vmem:[%s1510_s2] sm:$0xff] %v1095_v21  ;;  %877 = vmatmul.mubr.f32.vlgmr.msra.gmra.mxu1 %v1095_v21 }
 0x101   :  { %915 = vmatpush3.msra.mxu1 %v1161_v1  ;;  %946 = vmatprep.mubr.msk.f32.mxu1 %vm1136_vm0, %v1135_v0 }
 0x102   :  { %916 = vmatprep.subr.mxu1 %v1135_v0 }
 0x103   :  { %917 = vmatpush3.msra.mxu1 %v1163_v2 }
 0x104   :  { %918 = vmatprep.subr.mxu1 %v1135_v0 }
 0x105   :  { %919 = vmatpush3.msra.mxu1 %v1168_v3 }
 0x106   :  { %920 = vmatprep.subr.mxu1 %v1135_v0 }
 0x107   :  { %921 = vmatpush3.msra.mxu1 %v1174_v4 }
 0x108   :  { %922 = vmatprep.subr.mxu1 %v1135_v0 }
 0x109   :  { %923 = vmatpush3.msra.mxu1 %v1180_v5 }
 0x10a   :  { %924 = vmatprep.subr.mxu1 %v1135_v0 }
 0x10b   :  { %925 = vmatpush3.msra.mxu1 %v1186_v6 }
 0x10c   :  { %926 = vmatprep.subr.mxu1 %v1135_v0 }
 0x10d   :  { %927 = vmatpush3.msra.mxu1 %v1192_v7 }
 0x10e   :  { %928 = vmatprep.subr.mxu1 %v1135_v0 }
 0x10f   :  { %929 = vmatpush3.msra.mxu1 %v1198_v8 }
 0x110   :  { %930 = vmatprep.subr.mxu1 %v1135_v0 }
 0x111   :  { %931 = vmatpush3.msra.mxu1 %v1204_v9 }
 0x112   :  { %932 = vmatprep.subr.mxu1 %v1135_v0 }
 0x113   :  { %933 = vmatpush3.msra.mxu1 %v1210_v10 }
 0x114   :  { %934 = vmatprep.subr.mxu1 %v1135_v0 }
 0x115   :  { %935 = vmatpush3.msra.mxu1 %v1216_v11 }
 0x116   :  { %936 = vmatprep.subr.mxu1 %v1135_v0 }
 0x117   :  { %937 = vmatpush3.msra.mxu1 %v1222_v12 }
 0x118   :  { %938 = vmatprep.subr.mxu1 %v1135_v0 }
 0x119   :  { %939 = vmatpush3.msra.mxu1 %v1228_v13 }
 0x11a   :  { %940 = vmatprep.subr.mxu1 %v1135_v0 }
 0x11b   :  { %941 = vmatpush3.msra.mxu1 %v1234_v14 }
 0x11c   :  { %942 = vmatprep.subr.mxu1 %v1135_v0 }
 0x11d   :  { %943 = vmatpush3.msra.mxu1 %v1240_v15 }
 0x11e   :  { %944 = vmatprep.subr.mxu1 %v1135_v0 }
 0x11f   :  { %945 = vmatpush3.msra.mxu1 %v1246_v16 }
 0x120   :  { %984 = vmatprep.subr.mxu1 %v1135_v0 }
 0x1c0   :  { %v189_v23 = vpop.f32.mrf.mxu1 }
 0x1c1   :  { %v193_v24 = vadd.f32 %v659_v22, %v189_v23 }
 0x1c2   :  { %v878_v25 = vpop.f32.mrf.mxu1 }
 0x1c3   :  { %1096 = vtanh.f32 %v193_v24 }
 0x1d0   :  { %v1097_v26 = vpop.eup %1096 }
 0x1d1   :  { %660 = vst [vmem:[%s1510_s2 + $0x8] sm:$0xff] %v1097_v26  ;;  %912 = vmatmul.mubr.f32.vlgmr.msra.gmra.mxu0 %v1097_v26 }
 0x1d2   :  { %950 = vmatpush3.msra.mxu0 %v1161_v1  ;;  %981 = vmatprep.mubr.msk.f32.mxu0 %vm1136_vm0, %v1135_v0 }
 0x1d3   :  { %951 = vmatprep.subr.mxu0 %v1135_v0 }
 0x1d4   :  { %952 = vmatpush3.msra.mxu0 %v1163_v2 }
 0x1d5   :  { %953 = vmatprep.subr.mxu0 %v1135_v0 }
 0x1d6   :  { %954 = vmatpush3.msra.mxu0 %v1168_v3 }
 0x1d7   :  { %955 = vmatprep.subr.mxu0 %v1135_v0 }
 0x1d8   :  { %956 = vmatpush3.msra.mxu0 %v1174_v4 }
 0x1d9   :  { %957 = vmatprep.subr.mxu0 %v1135_v0 }
 0x1da   :  { %958 = vmatpush3.msra.mxu0 %v1180_v5 }
 0x1db   :  { %959 = vmatprep.subr.mxu0 %v1135_v0 }
 0x1dc   :  { %960 = vmatpush3.msra.mxu0 %v1186_v6 }
 0x1dd   :  { %961 = vmatprep.subr.mxu0 %v1135_v0 }
 0x1de   :  { %962 = vmatpush3.msra.mxu0 %v1192_v7 }
 0x1df   :  { %963 = vmatprep.subr.mxu0 %v1135_v0 }
 0x1e0   :  { %964 = vmatpush3.msra.mxu0 %v1198_v8 }
 0x1e1   :  { %965 = vmatprep.subr.mxu0 %v1135_v0 }
 0x1e2   :  { %966 = vmatpush3.msra.mxu0 %v1204_v9 }
 0x1e3   :  { %967 = vmatprep.subr.mxu0 %v1135_v0 }
 0x1e4   :  { %968 = vmatpush3.msra.mxu0 %v1210_v10 }
 0x1e5   :  { %969 = vmatprep.subr.mxu0 %v1135_v0 }
 0x1e6   :  { %970 = vmatpush3.msra.mxu0 %v1216_v11 }
 0x1e7   :  { %971 = vmatprep.subr.mxu0 %v1135_v0 }
 0x1e8   :  { %972 = vmatpush3.msra.mxu0 %v1222_v12 }
 0x1e9   :  { %973 = vmatprep.subr.mxu0 %v1135_v0 }
 0x1ea   :  { %974 = vmatpush3.msra.mxu0 %v1228_v13 }
 0x1eb   :  { %975 = vmatprep.subr.mxu0 %v1135_v0 }
 0x1ec   :  { %976 = vmatpush3.msra.mxu0 %v1234_v14 }
 0x1ed   :  { %977 = vmatprep.subr.mxu0 %v1135_v0 }
 0x1ee   :  { %978 = vmatpush3.msra.mxu0 %v1240_v15 }
 0x1ef   :  { %979 = vmatprep.subr.mxu0 %v1135_v0 }
 0x1f0   :  { %980 = vmatpush3.msra.mxu0 %v1246_v16 }
 0x1f1   :  { %1019 = vmatprep.subr.mxu0 %v1135_v0 }
 0x291   :  { %v265_v28 = vpop.f32.mrf.mxu0 }
 0x292   :  { %v269_v29 = vadd.f32 %v661_v27, %v265_v28 }
 0x293   :  { %v913_v30 = vpop.f32.mrf.mxu0 }
 0x294   :  { %1098 = vtanh.f32 %v269_v29 }
 0x2a1   :  { %v1099_v31 = vpop.eup %1098 }
 0x2a2   :  { %662 = vst [vmem:[%s1510_s2 + $0x10] sm:$0xff] %v1099_v31  ;;  %947 = vmatmul.mubr.f32.vlgmr.msra.gmra.mxu1 %v1099_v31 }
 0x2a3   :  { %985 = vmatpush3.msra.mxu1 %v1161_v1  ;;  %1016 = vmatprep.mubr.msk.f32.mxu1 %vm1136_vm0, %v1135_v0 }
 0x2a4   :  { %986 = vmatprep.subr.mxu1 %v1135_v0 }
 0x2a5   :  { %987 = vmatpush3.msra.mxu1 %v1163_v2 }
 0x2a6   :  { %988 = vmatprep.subr.mxu1 %v1135_v0 }
 0x2a7   :  { %989 = vmatpush3.msra.mxu1 %v1168_v3 }
 0x2a8   :  { %990 = vmatprep.subr.mxu1 %v1135_v0 }
 0x2a9   :  { %991 = vmatpush3.msra.mxu1 %v1174_v4 }
 0x2aa   :  { %992 = vmatprep.subr.mxu1 %v1135_v0 }
 0x2ab   :  { %993 = vmatpush3.msra.mxu1 %v1180_v5 }
 0x2ac   :  { %994 = vmatprep.subr.mxu1 %v1135_v0 }
 0x2ad   :  { %995 = vmatpush3.msra.mxu1 %v1186_v6 }
 0x2ae   :  { %996 = vmatprep.subr.mxu1 %v1135_v0 }
 0x2af   :  { %997 = vmatpush3.msra.mxu1 %v1192_v7 }
 0x2b0   :  { %998 = vmatprep.subr.mxu1 %v1135_v0 }
 0x2b1   :  { %999 = vmatpush3.msra.mxu1 %v1198_v8 }
 0x2b2   :  { %1000 = vmatprep.subr.mxu1 %v1135_v0 }
 0x2b3   :  { %1001 = vmatpush3.msra.mxu1 %v1204_v9 }
 0x2b4   :  { %1002 = vmatprep.subr.mxu1 %v1135_v0 }
 0x2b5   :  { %1003 = vmatpush3.msra.mxu1 %v1210_v10 }
 0x2b6   :  { %1004 = vmatprep.subr.mxu1 %v1135_v0 }
 0x2b7   :  { %1005 = vmatpush3.msra.mxu1 %v1216_v11 }
 0x2b8   :  { %1006 = vmatprep.subr.mxu1 %v1135_v0 }
 0x2b9   :  { %1007 = vmatpush3.msra.mxu1 %v1222_v12 }
 0x2ba   :  { %1008 = vmatprep.subr.mxu1 %v1135_v0 }
 0x2bb   :  { %1009 = vmatpush3.msra.mxu1 %v1228_v13 }
 0x2bc   :  { %1010 = vmatprep.subr.mxu1 %v1135_v0 }
 0x2bd   :  { %1011 = vmatpush3.msra.mxu1 %v1234_v14 }
 0x2be   :  { %1012 = vmatprep.subr.mxu1 %v1135_v0 }
 0x2bf   :  { %1013 = vmatpush3.msra.mxu1 %v1240_v15 }
 0x2c0   :  { %1014 = vmatprep.subr.mxu1 %v1135_v0 }
 0x2c1   :  { %1015 = vmatpush3.msra.mxu1 %v1246_v16 }
 0x2c2   :  { %1054 = vmatprep.subr.mxu1 %v1135_v0 }
 0x362   :  { %v341_v33 = vpop.f32.mrf.mxu1 }
 0x363   :  { %v345_v34 = vadd.f32 %v663_v32, %v341_v33 }
 0x364   :  { %v948_v35 = vpop.f32.mrf.mxu1 }
 0x365   :  { %1100 = vtanh.f32 %v345_v34 }
 0x372   :  { %v1101_v36 = vpop.eup %1100 }
 0x373   :  { %664 = vst [vmem:[%s1510_s2 + $0x18] sm:$0xff] %v1101_v36  ;;  %982 = vmatmul.mubr.f32.vlgmr.msra.gmra.mxu0 %v1101_v36 }
 0x374   :  { %1020 = vmatpush3.msra.mxu0 %v1161_v1  ;;  %1051 = vmatprep.mubr.msk.f32.mxu0 %vm1136_vm0, %v1135_v0 }
 0x375   :  { %1021 = vmatprep.subr.mxu0 %v1135_v0 }
 0x376   :  { %1022 = vmatpush3.msra.mxu0 %v1163_v2 }
 0x377   :  { %1023 = vmatprep.subr.mxu0 %v1135_v0 }
 0x378   :  { %1024 = vmatpush3.msra.mxu0 %v1168_v3 }
 0x379   :  { %1025 = vmatprep.subr.mxu0 %v1135_v0 }
 0x37a   :  { %1026 = vmatpush3.msra.mxu0 %v1174_v4 }
 0x37b   :  { %1027 = vmatprep.subr.mxu0 %v1135_v0 }
 0x37c   :  { %1028 = vmatpush3.msra.mxu0 %v1180_v5 }
 0x37d   :  { %1029 = vmatprep.subr.mxu0 %v1135_v0 }
 0x37e   :  { %1030 = vmatpush3.msra.mxu0 %v1186_v6 }
 0x37f   :  { %1031 = vmatprep.subr.mxu0 %v1135_v0 }
 0x380   :  { %1032 = vmatpush3.msra.mxu0 %v1192_v7 }
 0x381   :  { %1033 = vmatprep.subr.mxu0 %v1135_v0 }
 0x382   :  { %1034 = vmatpush3.msra.mxu0 %v1198_v8 }
 0x383   :  { %1035 = vmatprep.subr.mxu0 %v1135_v0 }
 0x384   :  { %1036 = vmatpush3.msra.mxu0 %v1204_v9 }
 0x385   :  { %1037 = vmatprep.subr.mxu0 %v1135_v0 }
 0x386   :  { %1038 = vmatpush3.msra.mxu0 %v1210_v10 }
 0x387   :  { %1039 = vmatprep.subr.mxu0 %v1135_v0 }
 0x388   :  { %1040 = vmatpush3.msra.mxu0 %v1216_v11 }
 0x389   :  { %1041 = vmatprep.subr.mxu0 %v1135_v0 }
 0x38a   :  { %1042 = vmatpush3.msra.mxu0 %v1222_v12 }
 0x38b   :  { %1043 = vmatprep.subr.mxu0 %v1135_v0 }
 0x38c   :  { %1044 = vmatpush3.msra.mxu0 %v1228_v13 }
 0x38d   :  { %1045 = vmatprep.subr.mxu0 %v1135_v0 }
 0x38e   :  { %1046 = vmatpush3.msra.mxu0 %v1234_v14 }
 0x38f   :  { %1047 = vmatprep.subr.mxu0 %v1135_v0 }
 0x390   :  { %1048 = vmatpush3.msra.mxu0 %v1240_v15 }
 0x391   :  { %1049 = vmatprep.subr.mxu0 %v1135_v0 }
 0x392   :  { %1050 = vmatpush3.msra.mxu0 %v1246_v16 }
 0x433   :  { %v417_v38 = vpop.f32.mrf.mxu0 }
 0x434   :  { %v421_v39 = vadd.f32 %v665_v37, %v417_v38 }
 0x435   :  { %v983_v40 = vpop.f32.mrf.mxu0 }
 0x436   :  { %1102 = vtanh.f32 %v421_v39 }
 0x443   :  { %v1103_v41 = vpop.eup %1102 }
 0x444   :  { %666 = vst [vmem:[%s1510_s2 + $0x20] sm:$0xff] %v1103_v41  ;;  %1017 = vmatmul.mubr.f32.vlgmr.msra.gmra.mxu1 %v1103_v41 }
 0x445   :  { %1055 = vmatpush3.msra.mxu1 %v1161_v1  ;;  %1086 = vmatprep.mubr.msk.f32.mxu1 %vm1136_vm0, %v1135_v0 }
 0x446   :  { %1056 = vmatprep.subr.mxu1 %v1135_v0 }
 0x447   :  { %1057 = vmatpush3.msra.mxu1 %v1163_v2 }
 0x448   :  { %1058 = vmatprep.subr.mxu1 %v1135_v0 }
 0x449   :  { %1059 = vmatpush3.msra.mxu1 %v1168_v3 }
 0x44a   :  { %1060 = vmatprep.subr.mxu1 %v1135_v0 }
 0x44b   :  { %1061 = vmatpush3.msra.mxu1 %v1174_v4 }
 0x44c   :  { %1062 = vmatprep.subr.mxu1 %v1135_v0 }
 0x44d   :  { %1063 = vmatpush3.msra.mxu1 %v1180_v5 }
 0x44e   :  { %1064 = vmatprep.subr.mxu1 %v1135_v0 }
 0x44f   :  { %1065 = vmatpush3.msra.mxu1 %v1186_v6 }
 0x450   :  { %1066 = vmatprep.subr.mxu1 %v1135_v0 }
 0x451   :  { %1067 = vmatpush3.msra.mxu1 %v1192_v7 }
 0x452   :  { %1068 = vmatprep.subr.mxu1 %v1135_v0 }
 0x453   :  { %1069 = vmatpush3.msra.mxu1 %v1198_v8 }
 0x454   :  { %1070 = vmatprep.subr.mxu1 %v1135_v0 }
 0x455   :  { %1071 = vmatpush3.msra.mxu1 %v1204_v9 }
 0x456   :  { %1072 = vmatprep.subr.mxu1 %v1135_v0 }
 0x457   :  { %1073 = vmatpush3.msra.mxu1 %v1210_v10 }
 0x458   :  { %1074 = vmatprep.subr.mxu1 %v1135_v0 }
 0x459   :  { %1075 = vmatpush3.msra.mxu1 %v1216_v11 }
 0x45a   :  { %1076 = vmatprep.subr.mxu1 %v1135_v0 }
 0x45b   :  { %1077 = vmatpush3.msra.mxu1 %v1222_v12 }
 0x45c   :  { %1078 = vmatprep.subr.mxu1 %v1135_v0 }
 0x45d   :  { %1079 = vmatpush3.msra.mxu1 %v1228_v13 }
 0x45e   :  { %1080 = vmatprep.subr.mxu1 %v1135_v0 }
 0x45f   :  { %1081 = vmatpush3.msra.mxu1 %v1234_v14 }
 0x460   :  { %1082 = vmatprep.subr.mxu1 %v1135_v0 }
 0x461   :  { %1083 = vmatpush3.msra.mxu1 %v1240_v15 }
 0x462   :  { %1084 = vmatprep.subr.mxu1 %v1135_v0 }
 0x463   :  { %1085 = vmatpush3.msra.mxu1 %v1246_v16 }
 0x504   :  { %v493_v43 = vpop.f32.mrf.mxu1 }
 0x505   :  { %v497_v44 = vadd.f32 %v667_v42, %v493_v43 }
 0x506   :  { %v1018_v45 = vpop.f32.mrf.mxu1 }
 0x507   :  { %1104 = vtanh.f32 %v497_v44 }
 0x514   :  { %v1105_v46 = vpop.eup %1104 }
 0x515   :  { %668 = vst [vmem:[%s1510_s2 + $0x28] sm:$0xff] %v1105_v46  ;;  %1052 = vmatmul.mubr.f32.vlgmr.msra.gmra.mxu0 %v1105_v46 }
 0x5d5   :  { %v569_v48 = vpop.f32.mrf.mxu0 }
 0x5d6   :  { %v573_v49 = vadd.f32 %v669_v47, %v569_v48 }
 0x5d7   :  { %v1053_v50 = vpop.f32.mrf.mxu0 }
 0x5d8   :  { %1106 = vtanh.f32 %v573_v49 }
 0x5e5   :  { %v1107_v51 = vpop.eup %1106 }
 0x5e6   :  { %670 = vst [vmem:[%s1510_s2 + $0x30] sm:$0xff] %v1107_v51  ;;  %1087 = vmatmul.mubr.f32.vlgmr.msra.gmra.mxu1 %v1107_v51 }
 0x6a6   :  { %v645_v53 = vpop.f32.mrf.mxu1 }
 0x6a7   :  { %v649_v54 = vadd.f32 %v671_v52, %v645_v53 }
 0x6a8   :  { %v1088_v55 = vpop.f32.mrf.mxu1 }
 0x6a9   :  { %1108 = vtanh.f32 %v649_v54 }
 0x6b6   :  { %v1109_v56 = vpop.eup %1108 }
 0x6b7   :  { %672 = vst [vmem:[%s1510_s2 + $0x38] sm:$0xff] %v1109_v56 }
 0x6b8   :  { %658 = vsyncpa [#allocation4], 1 }

</bundles_post_ra>
